<compile_context>
chip_gen: v5e
topology: v5e:2x2
jax: 0.10.0
libtpu: 0.0.40
codegen_flags: <defaults>
</compile_context>

<pallas_src>
import jax
import jax.numpy as jnp
from jax.experimental import pallas as pl
from jax.experimental.pallas import tpu as pltpu

_LANE = 128
_SUBLANE = 8
# Per-step input-block budget: 8 MiB in + 4 MiB out, double-buffered (~24 MiB
# f32) fits comfortably inside v7x's 64 MiB VMEM and already amortizes the
# per-step overhead to <10% on every generation.  (v5e/v6e could take 2x
# larger tiles, but the extra win is a few % and this keeps one portable path.)
_INPUT_BLOCK_BYTES = 8 * 1024 * 1024


def _round_up(n, m):
    return ((n + m - 1) // m) * m


def _cdiv(n, m):
    return (n + m - 1) // m


def _affine_kernel(params_ref, xt_ref, o_ref):
    """y = w0*x0 + w1*x1 + b over one sublane/lane-dense batch tile.

    params_ref: SMEM (3,) f32 -> [w0, w1, b]   (exactly folded two-layer affine)
    xt_ref:     VMEM (2, rt, 128) in the input dtype (SoA: feature, rows, lanes)
    o_ref:      VMEM (rt, 128) in the input dtype
    """
    w0 = params_ref[0]
    w1 = params_ref[1]
    b = params_ref[2]
    x0 = xt_ref[0].astype(jnp.float32)          # dense (rt, 128) vregs
    x1 = xt_ref[1].astype(jnp.float32)
    o_ref[...] = (x0 * w0 + x1 * w1 + b).astype(o_ref.dtype)  # VPU FMAs only


def circle_model_v0(x, w1, b1, w2, b2, *, input_block_bytes=_INPUT_BLOCK_BYTES):
    """Forward of CircleModelV0: Linear(2,5) -> Linear(5,1) (no nonlinearity).

    x: (B, 2). Weights pre-transposed to (in, out): w1 (2,5), b1 (5,),
    w2 (5,1), b2 (1,); reference math is (x @ w1 + b1) @ w2 + b2.
    """
    B = x.shape[0]
    dt = x.dtype
    itemsize = x.dtype.itemsize

    # Exact algebraic collapse of the two affine layers (O(10) flops, f32):
    #   y = (x @ W1 + b1) @ W2 + b2 = x @ (W1 W2) + (b1 W2 + b2)
    w_fold = (w1.astype(jnp.float32) @ w2.astype(jnp.float32)).reshape(2)
    b_fold = (b1.astype(jnp.float32) @ w2.astype(jnp.float32)).reshape(1) \
        + b2.astype(jnp.float32).reshape(1)
    params = jnp.concatenate([w_fold, b_fold])                 # (3,) f32 -> SMEM

    # --- Tiling: batch -> rows of 128 lanes, rows tiled in sublane-dense blocks.
    rows = _cdiv(B, _LANE)                       # rows of 128 batch elements
    rows8 = _round_up(max(rows, 1), _SUBLANE)    # sublane-dense granularity
    # Largest tile (in sublane rows) keeping one input block under budget.
    rt_cap = max(_SUBLANE,
                 (input_block_bytes // (2 * _LANE * itemsize)) // _SUBLANE * _SUBLANE)
    # Pick the step count first (>=4-8 steps when there is enough work, for
    # pipelining + v7x megacore), then the tile size, so padding waste is
    # O(1/n_steps) rather than up to a whole tile.
    min_steps = min(8, max(1, rows8 // _SUBLANE))
    n_steps = max(_cdiv(rows8, rt_cap), min_steps)
    rt = min(rt_cap, _round_up(_cdiv(rows8, n_steps), _SUBLANE))
    n_steps = _cdiv(rows8, rt)
    R = n_steps * rt
    b_pad = R * _LANE

    # SoA layout with batch on the lane axis, kept in the input dtype (no f32
    # upcast pass); transpose + pad + reshape fuse into one XLA copy of x.
    # TODO(synk): accept x in (2, B) SoA layout upstream to remove even that copy.
    xt = jnp.pad(jnp.transpose(x), ((0, 0), (0, b_pad - B))).reshape(2, R, _LANE)

    block_in = 2 * rt * _LANE * itemsize
    block_out = rt * _LANE * itemsize
    # Double-buffered footprint + headroom; floor 16 MiB, cap 48 MiB (< v7x phys).
    vmem_limit = min(max(2 * (block_in + block_out) + (4 << 20), 16 << 20), 48 << 20)

    out = pl.pallas_call(
        _affine_kernel,
        out_shape=jax.ShapeDtypeStruct((R, _LANE), dt),        # emit in input dtype
        grid=(n_steps,),
        in_specs=[
            pl.BlockSpec(memory_space=pltpu.MemorySpace.SMEM),   # folded scalars
            pl.BlockSpec((2, rt, _LANE), lambda i: (0, i, 0)),   # dense input tile
        ],
        out_specs=pl.BlockSpec((rt, _LANE), lambda i: (i, 0)),   # dense output tile
        compiler_params=pltpu.CompilerParams(
            dimension_semantics=("parallel",),    # megacore sharding on v7x
            vmem_limit_bytes=vmem_limit,
        ),
    )(params, xt)

    # Free reshapes + one small slice (pad rows hold b_fold; dropped here).
    return out.reshape(b_pad)[:B].reshape(B, 1)


if __name__ == "__main__":
    key = jax.random.PRNGKey(0)
    kx, k1, kb1, k2, kb2 = jax.random.split(key, 5)

    # PyTorch stores Linear weight as (out, in); we pass pre-transposed (in, out).
    w1 = jax.random.normal(k1, (2, 5), dtype=jnp.float32) * 0.5
    b1 = jax.random.normal(kb1, (5,), dtype=jnp.float32) * 0.1
    w2 = jax.random.normal(k2, (5, 1), dtype=jnp.float32) * 0.5
    b2 = jax.random.normal(kb2, (1,), dtype=jnp.float32) * 0.1

    # Small batch of 2-D points (single-tile path), matching Linear(2,5)->Linear(5,1).
    B = 8
    x = jax.random.normal(kx, (B, 2), dtype=jnp.float32)
    out = jax.block_until_ready(circle_model_v0(x, w1, b1, w2, b2))
    ref = (x @ w1 + b1) @ w2 + b2
    assert out.shape == (B, 1) and out.dtype == x.dtype
    assert jnp.allclose(out, ref, atol=1e-5, rtol=1e-5)

    # Multi-step grid + padding path: force tiny tiles so grid=(4,) is exercised,
    # with B not a multiple of 128 to exercise lane/sublane padding + final slice.
    B2 = 4000
    x2 = jax.random.normal(kx, (B2, 2), dtype=jnp.float32)
    out2 = jax.block_until_ready(
        circle_model_v0(x2, w1, b1, w2, b2, input_block_bytes=2 * _LANE * 4 * _SUBLANE))
    ref2 = (x2 @ w1 + b1) @ w2 + b2
    assert out2.shape == (B2, 1)
    assert jnp.allclose(out2, ref2, atol=1e-5, rtol=1e-5)

    print("KERNEL_OK")
</pallas_src>

<mosaic_0001>
module attributes {stable_mosaic.version = 11 : i64} {
  func.func @_affine_kernel(%arg0: i32, %arg1: memref<3xf32, #tpu.memory_space<smem>>, %arg2: memref<2x8x128xf32, #tpu.memory_space<vmem>>, %arg3: memref<8x128xf32, #tpu.memory_space<vmem>>) attributes {dimension_semantics = [#tpu.dimension_semantics<parallel>], iteration_bounds = array<i64: 1>, scalar_prefetch = 0 : i64, scratch_operands = 0 : i64, tpu.core_type = #tpu.core_type<tc>, window_params = [{transform_indices = @transform_0, window_bounds = array<i64: 3>}, {transform_indices = @transform_1, window_bounds = array<i64: 2, 8, 128>}, {transform_indices = @transform_2, window_bounds = array<i64: 8, 128>}]} {
    %c0 = arith.constant 0 : index
    %0 = memref.load %arg1[%c0] : memref<3xf32, #tpu.memory_space<smem>>
    %c1 = arith.constant 1 : index
    %1 = memref.load %arg1[%c1] : memref<3xf32, #tpu.memory_space<smem>>
    %c2 = arith.constant 2 : index
    %2 = memref.load %arg1[%c2] : memref<3xf32, #tpu.memory_space<smem>>
    %c0_0 = arith.constant 0 : index
    %c0_1 = arith.constant 0 : index
    %c0_2 = arith.constant 0 : index
    %3 = vector.load %arg2[%c0_0, %c0_1, %c0_2] : memref<2x8x128xf32, #tpu.memory_space<vmem>>, vector<1x8x128xf32>
    %4 = vector.shape_cast %3 : vector<1x8x128xf32> to vector<8x128xf32>
    %c1_3 = arith.constant 1 : index
    %c0_4 = arith.constant 0 : index
    %c0_5 = arith.constant 0 : index
    %5 = vector.load %arg2[%c1_3, %c0_4, %c0_5] : memref<2x8x128xf32, #tpu.memory_space<vmem>>, vector<1x8x128xf32>
    %6 = vector.shape_cast %5 : vector<1x8x128xf32> to vector<8x128xf32>
    %7 = vector.broadcast %0 : f32 to vector<8x128xf32>
    %8 = arith.mulf %4, %7 : vector<8x128xf32>
    %9 = vector.broadcast %1 : f32 to vector<8x128xf32>
    %10 = arith.mulf %6, %9 : vector<8x128xf32>
    %11 = arith.addf %8, %10 : vector<8x128xf32>
    %12 = vector.broadcast %2 : f32 to vector<8x128xf32>
    %13 = arith.addf %11, %12 : vector<8x128xf32>
    %c0_6 = arith.constant 0 : index
    %c0_7 = arith.constant 0 : index
    %14 = vector.load %arg3[%c0_6, %c0_7] : memref<8x128xf32, #tpu.memory_space<vmem>>, vector<8x128xf32>
    tpu.vector_store %arg3[%c0_6, %c0_7], %13 {strides = array<i32>} : memref<8x128xf32, #tpu.memory_space<vmem>>, vector<8x128xf32>,
    return
  }
  func.func @transform_0(%arg0: i32) -> i32 {
    %c0_i32 = arith.constant 0 : i32
    %c0_i32_0 = arith.constant 0 : i32
    return %c0_i32 : i32
  }
  func.func @transform_1(%arg0: i32) -> (i32, i32, i32) {
    %c0_i32 = arith.constant 0 : i32
    %c0_i32_0 = arith.constant 0 : i32
    %c0_i32_1 = arith.constant 0 : i32
    return %c0_i32, %arg0, %c0_i32_0 : i32, i32, i32
  }
  func.func @transform_2(%arg0: i32) -> (i32, i32) {
    %c0_i32 = arith.constant 0 : i32
    %c0_i32_0 = arith.constant 0 : i32
    return %arg0, %c0_i32 : i32, i32
  }
}

</mosaic_0001>

<bundles_post_ra>
// kernel: tpu_custom_call.1
= control target key start
LH: loop header
LB: loop body
LE: loop exit
PB: predicated region body
PF: predicated region fallthrough
CT: control target
= control target key end

     0   :  { %7 = vsyncpa [#allocation5], 0  ;;  %s175_s0 = inlined_call_operand.hbm [shape: f32[3], index: 0, kind: input, shape index: {}]   ;;  %s176_s1 = inlined_call_operand.hbm [shape: f32[2,8,128], index: 1, kind: input, shape index: {}]   ;;  %s177_s2 = inlined_call_operand.hbm [shape: f32[8,128], index: 2, kind: output, shape index: {}]  }
   0x1   :  { %8 = vsyncpa [#allocation3], 0 }
   0x2   :  { %9 = vsyncpa [#allocation4], 0  ;;  %s15_s11 = sshll.u32 %s175_s0, 4  ;;  %s23_s14 = sshll.u32 %s176_s1, 4  ;;  %s16_s11 = int_to_ptr.hbm [resolvable:$true] %s15_s11  ;;  %s24_s14 = int_to_ptr.hbm [resolvable:$true] %s23_s14 }
   0x3   :  { %s146_s15 = smov [#allocation2]   ;;  %s147_s16 = smov [#allocation6]  }
   0x4   :  { %18 = dma.hbm_to_smem %s16_s11, 16, %s146_s15, [#allocation5]  }
   0x5   :  { %s25_s17 = sshll.u32 %s147_s16, 4  ;;  %s148_s18 = smov 128   ;;  %s26_s17 = int_to_ptr.vmem [resolvable:$true] %s25_s17 }
   0x6   :  { %s149_s19 = smov 8  }
   0x7   :  { %31 = dma.hbm_to_vmem [thread:$0]  %s24_s14, 256, %s26_s17, [#allocation3], %s148_s18, %s148_s18, %s149_s19  }
   0x8   :  { %140 = dma.done.wait [#allocation5], 16  }
   0x9   :  { %141 = vsyncadd [#allocation5], 4294967280 }
   0xa   :  { %142 = dma.done.wait [#allocation3], 256  }
   0xb   :  { %143 = vsyncadd [#allocation3], 4294967040 }
   0xc   :  { %40 = sfence }
   0xd   :  { %s41_s0 = sld [smem:[#allocation2]]  ;;  %v44_v0 = vld [vmem:[#allocation6] sm:$0xff]  ;;  %v46_v1 = vld [vmem:[#allocation6 + $0x8] sm:$0xff]  ;;  %s150_s1 = smov [#allocation7]  }
   0xe   :  { %s73_s20 = sld [smem:[#allocation2 + $0x1]]  ;;  %s60_s22 = sshll.u32 %s150_s1, 4  ;;  %s61_s22 = int_to_ptr.vmem [resolvable:$true] %s60_s22 }
   0xf   :  { %s74_s21 = sld [smem:[#allocation2 + $0x2]]  ;;  %s62_s25 = sshll.u32 %s177_s2, 4  ;;  %s63_s25 = int_to_ptr.hbm [resolvable:$true] %s62_s25 }
  0x13   :  { %v47_v2 = vstv %s41_s0 }
  0x14   :  { %v48_v3 = vmul.f32 %v47_v2, %v44_v0  ;;  %v49_v4 = vstv %s73_s20 }
  0x15   :  { %v50_v5 = vmul.f32 %v49_v4, %v46_v1  ;;  %v52_v6 = vstv %s74_s21 }
  0x17   :  { %v51_v7 = vadd.f32 %v50_v5, %v48_v3 }
  0x19   :  { %v53_v8 = vadd.f32 %v52_v6, %v51_v7 }
  0x1b   :  { %54 = vst [vmem:[#allocation7] sm:$0xff] %v53_v8 }
  0x1c   :  { %65 = dma.vmem_to_hbm [thread:$0]  %s61_s22, 128, %s63_s25, [#allocation4]  }
  0x1d   :  { %144 = dma.done.wait [#allocation4], 128  }
  0x1e   :  { %145 = vsyncadd [#allocation4], 4294967168 }
  0x1f   :  { %70 = vsyncpa [#allocation3], 1 }
  0x20   :  { %71 = vsyncpa [#allocation4], 1 }
  0x21   :  { %72 = vsyncpa [#allocation5], 1 }

</bundles_post_ra>
